<compile_context>
chip_gen: v6e
topology: v6e:2x2x1
jax: 0.10.0
libtpu: 0.0.40
codegen_flags: <defaults>
</compile_context>

<pallas_src>
import math
from functools import partial

import jax
import jax.numpy as jnp
from jax.experimental import pallas as pl
from jax.experimental.pallas import tpu as pltpu


def _round_up(a, b):
    return (a + b - 1) // b * b


def _vmem_limit(*nbytes):
    # Requested buffers (already counting double-buffering) + 50% headroom,
    # capped at 64 MiB so the same setting is legal on v7x.
    total = int(sum(nbytes))
    return min(64 * 1024 * 1024, int(total * 1.5) + (2 << 20))


# ----------------------------------------------------------------- kernels ---

def _support_kernel(x_ref, w_ref, out_ref):
    # support = x_tile @ W   (f32 accumulate, stored in the adj compute dtype)
    out_ref[...] = jnp.dot(
        x_ref[...], w_ref[...], preferred_element_type=jnp.float32
    ).astype(out_ref.dtype)


def _aggregate_kernel(adj_ref, sup_ref, b_ref, out_ref, *, activation):
    # z_tile = adj_tile @ support + bias   (bf16 x bf16 MXU, f32 accumulate)
    z = jnp.dot(adj_ref[...], sup_ref[...], preferred_element_type=jnp.float32)
    z = z + b_ref[...]
    if activation == "relu":
        z = jnp.maximum(z, 0.0)
    elif activation == "log_softmax":
        m = jnp.max(z, axis=1, keepdims=True)
        s = z - m
        lse = jnp.log(jnp.sum(jnp.exp(s), axis=1, keepdims=True))
        z = s - lse
    out_ref[...] = z.astype(out_ref.dtype)


# ---------------------------------------------------------------- wrappers ---

def _support_matmul(x, w, out_dtype, block_rows):
    n_pad, f_in = x.shape
    f_out = w.shape[1]
    vmem = _vmem_limit(
        2 * block_rows * f_in * x.dtype.itemsize,
        2 * f_in * f_out * w.dtype.itemsize,
        2 * block_rows * f_out * jnp.dtype(out_dtype).itemsize,
    )
    return pl.pallas_call(
        _support_kernel,
        out_shape=jax.ShapeDtypeStruct((n_pad, f_out), out_dtype),
        grid=(n_pad // block_rows,),
        in_specs=[
            pl.BlockSpec((block_rows, f_in), lambda i: (i, 0)),
            pl.BlockSpec((f_in, f_out), lambda i: (0, 0)),
        ],
        out_specs=pl.BlockSpec((block_rows, f_out), lambda i: (i, 0)),
        compiler_params=pltpu.CompilerParams(
            dimension_semantics=("parallel",), vmem_limit_bytes=vmem),
        cost_estimate=pl.CostEstimate(
            flops=2 * n_pad * f_in * f_out,
            transcendentals=0,
            bytes_accessed=int(x.nbytes + w.nbytes
                               + n_pad * f_out * jnp.dtype(out_dtype).itemsize)),
    )(x, w)


def _aggregate(adj, sup, b, activation, out_dtype, block_rows):
    n_pad = adj.shape[0]
    f_out = sup.shape[1]
    out_item = jnp.dtype(out_dtype).itemsize
    vmem = _vmem_limit(
        2 * block_rows * n_pad * adj.dtype.itemsize,   # adj double buffer
        2 * n_pad * f_out * sup.dtype.itemsize,        # resident support
        2 * b.size * b.dtype.itemsize,
        2 * block_rows * f_out * out_item,             # output double buffer
    )
    return pl.pallas_call(
        partial(_aggregate_kernel, activation=activation),
        out_shape=jax.ShapeDtypeStruct((n_pad, f_out), out_dtype),
        grid=(n_pad // block_rows,),
        in_specs=[
            pl.BlockSpec((block_rows, n_pad), lambda i: (i, 0)),   # adj row tile
            pl.BlockSpec((n_pad, f_out), lambda i: (0, 0)),        # support (resident)
            pl.BlockSpec((1, f_out), lambda i: (0, 0)),            # bias (resident)
        ],
        out_specs=pl.BlockSpec((block_rows, f_out), lambda i: (i, 0)),
        compiler_params=pltpu.CompilerParams(
            dimension_semantics=("parallel",), vmem_limit_bytes=vmem),
        cost_estimate=pl.CostEstimate(
            flops=2 * n_pad * n_pad * f_out,
            transcendentals=(n_pad * f_out if activation == "log_softmax" else 0),
            bytes_accessed=int(adj.nbytes + sup.nbytes + b.nbytes
                               + n_pad * f_out * out_item)),
    )(adj, sup, b)


def gcn_forward(x, adj, w1, b1, w2, b2, *, block_rows=128,
                adj_dtype=jnp.bfloat16):
    """log_softmax(adj @ (relu(adj @ (x@W1) + b1) @ W2) + b2, axis=1)."""
    n = x.shape[0]
    block_rows = max(8, _round_up(block_rows, 8))
    n_pad = _round_up(max(n, block_rows), block_rows)

    x_p = jnp.pad(x.astype(jnp.float32), ((0, n_pad - n), (0, 0)))
    adj_p = jnp.pad(adj.astype(jnp.float32),
                    ((0, n_pad - n), (0, n_pad - n))).astype(adj_dtype)
    b1_2d = b1.reshape(1, -1).astype(jnp.float32)
    b2_2d = b2.reshape(1, -1).astype(jnp.float32)

    # Layer 1: h = relu(adj @ (x @ W1) + b1)
    sup1 = _support_matmul(x_p, w1.astype(jnp.float32), adj_dtype, block_rows)
    h = _aggregate(adj_p, sup1, b1_2d, "relu", jnp.float32, block_rows)

    # TODO(synk): F.dropout(h, p, training) — eval-mode identity here; training
    # mode would use pltpu.prng_seed + pltpu.prng_random_bits for the mask.

    # Layer 2: z = adj @ (h @ W2) + b2, then log_softmax over features
    sup2 = _support_matmul(h, w2.astype(jnp.float32), adj_dtype, block_rows)
    out = _aggregate(adj_p, sup2, b2_2d, "log_softmax", jnp.float32, block_rows)

    return out[:n]


def init_gc_params(key, in_features, out_features):
    """Matches GraphConvolution.reset_parameters: U(-stdv, stdv), stdv=1/sqrt(out)."""
    stdv = 1.0 / math.sqrt(out_features)
    kw, kb = jax.random.split(key)
    w = jax.random.uniform(kw, (in_features, out_features), jnp.float32, -stdv, stdv)
    b = jax.random.uniform(kb, (out_features,), jnp.float32, -stdv, stdv)
    return w, b


if __name__ == "__main__":
    # Small deterministic example: N=256 nodes (2 row-tiles per pass),
    # nfeat=64, nhid=32, nclass=8.
    key = jax.random.PRNGKey(0)
    k_x, k_adj, k_gc1, k_gc2 = jax.random.split(key, 4)

    N, nfeat, nhid, nclass = 256, 64, 32, 8

    x = jax.random.normal(k_x, (N, nfeat), jnp.float32)

    # Dense symmetric row-normalized adjacency (with self loops)
    a = (jax.random.uniform(k_adj, (N, N)) < 0.1).astype(jnp.float32)
    a = jnp.maximum(a, a.T) + jnp.eye(N, dtype=jnp.float32)
    a = a / jnp.sum(a, axis=1, keepdims=True)

    w1, b1 = init_gc_params(k_gc1, nfeat, nhid)
    w2, b2 = init_gc_params(k_gc2, nhid, nclass)

    out = gcn_forward(x, a, w1, b1, w2, b2, block_rows=128)
    jax.block_until_ready(out)
    assert out.shape == (N, nclass)

    # Parity reference (same bf16-adjacency / bf16-support numerics as kernel).
    adj_bf = a.astype(jnp.bfloat16)
    sup1_r = (x @ w1).astype(jnp.bfloat16)
    h_r = jnp.maximum(
        jnp.dot(adj_bf, sup1_r, preferred_element_type=jnp.float32) + b1, 0.0)
    sup2_r = (h_r @ w2).astype(jnp.bfloat16)
    z_r = jnp.dot(adj_bf, sup2_r, preferred_element_type=jnp.float32) + b2
    ref = jax.nn.log_softmax(z_r, axis=1)
    assert jnp.allclose(out, ref, atol=1e-3, rtol=1e-3), "mismatch vs bf16 parity ref"

    # Sanity vs the full-f32 PyTorch-equivalent reference (bf16 adj loses ~3 digits).
    h32 = jnp.maximum(a @ (x @ w1) + b1, 0.0)
    z32 = a @ (h32 @ w2) + b2
    ref32 = jax.nn.log_softmax(z32, axis=1)
    assert jnp.allclose(out, ref32, atol=2e-2), "mismatch vs f32 reference"

    print("KERNEL_OK")
</pallas_src>

<mosaic_0001>
module attributes {stable_mosaic.version = 11 : i64} {
  func.func @_support_kernel(%arg0: i32, %arg1: memref<128x64xf32, #tpu.memory_space<vmem>>, %arg2: memref<64x32xf32, #tpu.memory_space<vmem>>, %arg3: memref<128x32xbf16, #tpu.memory_space<vmem>>) attributes {dimension_semantics = [#tpu.dimension_semantics<parallel>], iteration_bounds = array<i64: 2>, scalar_prefetch = 0 : i64, scratch_operands = 0 : i64, tpu.core_type = #tpu.core_type<tc>, window_params = [{transform_indices = @transform_0, window_bounds = array<i64: 128, 64>}, {pipeline_mode = #tpu.pipeline_mode<synchronous>, transform_indices = @transform_1, window_bounds = array<i64: 64, 32>}, {transform_indices = @transform_2, window_bounds = array<i64: 128, 32>}]} {
    %c0 = arith.constant 0 : index
    %c0_0 = arith.constant 0 : index
    %0 = vector.load %arg1[%c0, %c0_0] : memref<128x64xf32, #tpu.memory_space<vmem>>, vector<128x64xf32>
    %c0_1 = arith.constant 0 : index
    %c0_2 = arith.constant 0 : index
    %1 = vector.load %arg2[%c0_1, %c0_2] : memref<64x32xf32, #tpu.memory_space<vmem>>, vector<64x32xf32>
    %cst = arith.constant dense<0.000000e+00> : vector<128x32xf32>
    %2 = tpu.matmul %0, %1, %cst {dimension_numbers = #tpu.dot_dimension_numbers<[1], [0], [0], [1], [0, 0, 1, 1], [], []>} : vector<128x64xf32>, vector<64x32xf32>, vector<128x32xf32> -> vector<128x32xf32>
    %3 = arith.truncf %2 : vector<128x32xf32> to vector<128x32xbf16>
    %c0_3 = arith.constant 0 : index
    %c0_4 = arith.constant 0 : index
    %4 = vector.load %arg3[%c0_3, %c0_4] : memref<128x32xbf16, #tpu.memory_space<vmem>>, vector<128x32xbf16>
    tpu.vector_store %arg3[%c0_3, %c0_4], %3 {strides = array<i32>} : memref<128x32xbf16, #tpu.memory_space<vmem>>, vector<128x32xbf16>,
    return
  }
  func.func @transform_0(%arg0: i32) -> (i32, i32) {
    %c0_i32 = arith.constant 0 : i32
    %c0_i32_0 = arith.constant 0 : i32
    return %arg0, %c0_i32 : i32, i32
  }
  func.func @transform_1(%arg0: i32) -> (i32, i32) {
    %c0_i32 = arith.constant 0 : i32
    %c0_i32_0 = arith.constant 0 : i32
    %c0_i32_1 = arith.constant 0 : i32
    return %c0_i32, %c0_i32_0 : i32, i32
  }
  func.func @transform_2(%arg0: i32) -> (i32, i32) {
    %c0_i32 = arith.constant 0 : i32
    %c0_i32_0 = arith.constant 0 : i32
    return %arg0, %c0_i32 : i32, i32
  }
}

</mosaic_0001>

<bundles_post_ra>
// kernel: tpu_custom_call.1
= control target key start
LH: loop header
LB: loop body
LE: loop exit
PB: predicated region body
PF: predicated region fallthrough
CT: control target
= control target key end

     0   :  { %s672_s9 = smov 0   ;;  %s785_s0 = inlined_call_operand.vmem [shape: f32[256,64], index: 0, kind: input, shape index: {}]   ;;  %s786_s1 = inlined_call_operand.vmem [shape: f32[64,32], index: 1, kind: input, shape index: {}]   ;;  %s787_s2 = inlined_call_operand.vmem [shape: bf16[256,32], index: 2, kind: output, shape index: {}]  }
   0x1 LB: > { %s502_s10 = sadd.s32 4294967295, %s655_s9   ;;  %p506_p0 = scmp.ge.s32.totalorder %s655_s9, 1  ;;  %s655_s9 = sphi %s672_s9, %s12_s9  }
   0x2   : > { %p113_p1 = scmp.lt.s32.totalorder %s655_s9, 3 }
   0x4   : > { %p114_p2 = pnand %p506_p0, %p113_p1 }
   0x5   : > { %s507_s15 = sshll.u32 (!%p114_p2), %s502_s10, 4 }
   0x6   : > { %117 = sbr.rel (%p114_p2) target bundleno = 239 (0xef), region = 28  ;;  %p136_p3 = scmp.lt.s32.totalorder (!%p114_p2), %s507_s15, 31 }
   0xb   : > { %v170_v0 = vld [vmem:[%s786_s1 + $0x38] sm:$0xff]  ;;  %v169_v1 = vld [vmem:[%s786_s1 + $0x30] sm:$0xff]  ;;  %v168_v2 = vld [vmem:[%s786_s1 + $0x28] sm:$0xff]  ;;  %s789_s15 = smov (!%p136_p3, %s507_s15), 31  ;;  %vm171_vm0 = vcmask 523264   ;;  %vm429_vm1 = vcmask 257024  }
   0xc   : > { %585 = vmatprep.subr.mxu0 %v170_v0  ;;  %625 = vmatprep.subr.mxu1 %v170_v0  ;;  %v167_v3 = vld [vmem:[%s786_s1 + $0x20] sm:$0xff]  ;;  %v166_v4 = vld [vmem:[%s786_s1 + $0x18] sm:$0xff]  ;;  %v165_v5 = vld [vmem:[%s786_s1 + $0x10] sm:$0xff]  ;;  %s508_s24 = sshll.u32 %s789_s15, 3  ;;  %s510_s4 = sshll.u32 %s789_s15, 2 }
   0xd   : > { %586 = vmatpush3.msra.mxu0 %v170_v0  ;;  %633 = vmatpush3.msra.mxu1 %v170_v0  ;;  %v164_v6 = vld [vmem:[%s786_s1 + $0x8] sm:$0xff]  ;;  %s707_s29 = scalar_lea.vmem %s785_s0, %s508_s24  ;;  %v163_v7 = vld [vmem:[%s786_s1] sm:$0xff]  ;;  %s748_s7 = scalar_lea.vmem %s787_s2, %s510_s4 }
   0xe   : > { %587 = vmatprep.subr.mxu0 %v169_v1  ;;  %626 = vmatprep.subr.mxu1 %v169_v1  ;;  %v147_v8 = vld [vmem:[%s707_s29] sm:$0xff]  ;;  %v148_v10 = vld [vmem:[%s707_s29 + $0x8] sm:$0xff]  ;;  %v149_v12 = vld [vmem:[%s707_s29 + $0x10] sm:$0xff] }
   0xf   : > { %588 = vmatpush3.msra.mxu0 %v169_v1  ;;  %634 = vmatpush3.msra.mxu1 %v169_v1  ;;  %v155_v9 = vld [vmem:[%s707_s29 + $0x40] sm:$0xff]  ;;  %v156_v11 = vld [vmem:[%s707_s29 + $0x48] sm:$0xff]  ;;  %v157_v13 = vld [vmem:[%s707_s29 + $0x50] sm:$0xff] }
  0x10   : > { %589 = vmatprep.subr.mxu0 %v168_v2  ;;  %627 = vmatprep.subr.mxu1 %v168_v2  ;;  %v150_v14 = vld [vmem:[%s707_s29 + $0x18] sm:$0xff]  ;;  %v151_v16 = vld [vmem:[%s707_s29 + $0x20] sm:$0xff]  ;;  %v152_v18 = vld [vmem:[%s707_s29 + $0x28] sm:$0xff] }
  0x11   : > { %590 = vmatpush3.msra.mxu0 %v168_v2  ;;  %635 = vmatpush3.msra.mxu1 %v168_v2  ;;  %v158_v15 = vld [vmem:[%s707_s29 + $0x58] sm:$0xff]  ;;  %v159_v17 = vld [vmem:[%s707_s29 + $0x60] sm:$0xff]  ;;  %v160_v19 = vld [vmem:[%s707_s29 + $0x68] sm:$0xff] }
  0x12   : > { %591 = vmatprep.subr.mxu0 %v167_v3  ;;  %628 = vmatprep.subr.mxu1 %v167_v3  ;;  %v153_v20 = vld [vmem:[%s707_s29 + $0x30] sm:$0xff]  ;;  %v154_v22 = vld [vmem:[%s707_s29 + $0x38] sm:$0xff] }
  0x13   : > { %592 = vmatpush3.msra.mxu0 %v167_v3  ;;  %636 = vmatpush3.msra.mxu1 %v167_v3  ;;  %v161_v21 = vld [vmem:[%s707_s29 + $0x70] sm:$0xff]  ;;  %v162_v23 = vld [vmem:[%s707_s29 + $0x78] sm:$0xff] }
  0x14   : > { %593 = vmatprep.subr.mxu0 %v166_v4  ;;  %629 = vmatprep.subr.mxu1 %v166_v4 }
  0x15   : > { %594 = vmatpush3.msra.mxu0 %v166_v4  ;;  %637 = vmatpush3.msra.mxu1 %v166_v4 }
  0x16   : > { %595 = vmatprep.subr.mxu0 %v165_v5  ;;  %630 = vmatprep.subr.mxu1 %v165_v5 }
  0x17   : > { %596 = vmatpush3.msra.mxu0 %v165_v5  ;;  %638 = vmatpush3.msra.mxu1 %v165_v5 }
  0x18   : > { %597 = vmatprep.subr.mxu0 %v164_v6  ;;  %631 = vmatprep.subr.mxu1 %v164_v6 }
  0x19   : > { %598 = vmatpush3.msra.mxu0 %v164_v6  ;;  %639 = vmatpush3.msra.mxu1 %v164_v6 }
  0x1a   : > { %599 = vmatprep.subr.mxu0 %v163_v7  ;;  %632 = vmatprep.subr.mxu1 %v163_v7 }
  0x1b   : > { %600 = vmatpush3.msra.mxu0 %v163_v7  ;;  %640 = vmatpush3.msra.mxu1 %v163_v7 }
  0x1c   : > { %601 = vmatprep.mubr.msk.f32.mxu0 %vm171_vm0, %v147_v8  ;;  %613 = vmatprep.mubr.msk.f32.mxu1 %vm171_vm0, %v155_v9 }
  0x1d   : > { %602 = vmatmul.mubr.msk.f32.vlgmr.msra.gmra.mxu0 %vm171_vm0, %v148_v10  ;;  %614 = vmatmul.mubr.msk.f32.vlgmr.msra.gmra.mxu1 %vm171_vm0, %v156_v11 }
  0x1e   : > { %604 = vmatprep.mubr.msk.f32.mxu0 %vm171_vm0, %v149_v12  ;;  %616 = vmatprep.mubr.msk.f32.mxu1 %vm171_vm0, %v157_v13 }
  0x21   : > { %605 = vmatmul.mubr.msk.f32.gmra.mxu0 %vm171_vm0, %v150_v14  ;;  %617 = vmatmul.mubr.msk.f32.gmra.mxu1 %vm171_vm0, %v158_v15 }
  0x22   : > { %607 = vmatprep.mubr.msk.f32.mxu0 %vm171_vm0, %v151_v16  ;;  %619 = vmatprep.mubr.msk.f32.mxu1 %vm171_vm0, %v159_v17 }
  0x25   : > { %608 = vmatmul.mubr.msk.f32.gmra.mxu0 %vm171_vm0, %v152_v18  ;;  %620 = vmatmul.mubr.msk.f32.gmra.mxu1 %vm171_vm0, %v160_v19 }
  0x26   : > { %610 = vmatprep.mubr.msk.f32.mxu0 %vm171_vm0, %v153_v20  ;;  %622 = vmatprep.mubr.msk.f32.mxu1 %vm171_vm0, %v161_v21 }
  0x29   : > { %611 = vmatmul.mubr.msk.f32.gmra.mxu0 %vm171_vm0, %v154_v22  ;;  %623 = vmatmul.mubr.msk.f32.gmra.mxu1 %vm171_vm0, %v162_v23 }
  0xdd   : > { %v603_v24 = vpop.f32.mrf.mxu0  ;;  %v615_v25 = vpop.f32.mrf.mxu1 }
  0xde   : > { %v546_v26 = vpack.c.bf16 %v603_v24, %v603_v24  ;;  %v554_v27 = vpack.c.bf16 %v615_v25, %v615_v25 }
  0xdf   : > { %v286_v28 = vpop.f32.mrf.mxu0  ;;  %v326_v29 = vpop.f32.mrf.mxu1 }
  0xe0   : > { %431 = vst.msk [vmem:[%s748_s7 + $0x4] sm:$0xf] %vm429_vm1, %v546_v26  ;;  %439 = vst.msk [vmem:[%s748_s7 + $0x24] sm:$0xf] %vm429_vm1, %v554_v27  ;;  %v545_v30 = vpack.c.bf16 %v286_v28, %v286_v28  ;;  %v553_v31 = vpack.c.bf16 %v326_v29, %v326_v29 }
  0xe1   : > { %v606_v32 = vpop.f32.mrf.mxu0  ;;  %v618_v33 = vpop.f32.mrf.mxu1 }
  0xe2   : > { %430 = vst.msk [vmem:[%s748_s7] sm:$0xf] %vm429_vm1, %v545_v30  ;;  %438 = vst.msk [vmem:[%s748_s7 + $0x20] sm:$0xf] %vm429_vm1, %v553_v31  ;;  %v548_v34 = vpack.c.bf16 %v606_v32, %v606_v32  ;;  %v556_v35 = vpack.c.bf16 %v618_v33, %v618_v33 }
  0xe3   : > { %v296_v36 = vpop.f32.mrf.mxu0  ;;  %v336_v37 = vpop.f32.mrf.mxu1 }
  0xe4   : > { %433 = vst.msk [vmem:[%s748_s7 + $0xc] sm:$0xf] %vm429_vm1, %v548_v34  ;;  %441 = vst.msk [vmem:[%s748_s7 + $0x2c] sm:$0xf] %vm429_vm1, %v556_v35  ;;  %v547_v38 = vpack.c.bf16 %v296_v36, %v296_v36  ;;  %v555_v39 = vpack.c.bf16 %v336_v37, %v336_v37 }
  0xe5   : > { %v609_v40 = vpop.f32.mrf.mxu0  ;;  %v621_v41 = vpop.f32.mrf.mxu1 }
  0xe6   : > { %432 = vst.msk [vmem:[%s748_s7 + $0x8] sm:$0xf] %vm429_vm1, %v547_v38  ;;  %440 = vst.msk [vmem:[%s748_s7 + $0x28] sm:$0xf] %vm429_vm1, %v555_v39  ;;  %v550_v42 = vpack.c.bf16 %v609_v40, %v609_v40  ;;  %v558_v43 = vpack.c.bf16 %v621_v41, %v621_v41 }
  0xe7   : > { %v306_v44 = vpop.f32.mrf.mxu0  ;;  %v346_v45 = vpop.f32.mrf.mxu1 }
  0xe8   : > { %435 = vst.msk [vmem:[%s748_s7 + $0x14] sm:$0xf] %vm429_vm1, %v550_v42  ;;  %443 = vst.msk [vmem:[%s748_s7 + $0x34] sm:$0xf] %vm429_vm1, %v558_v43  ;;  %v549_v46 = vpack.c.bf16 %v306_v44, %v306_v44  ;;  %v557_v47 = vpack.c.bf16 %v346_v45, %v346_v45 }
  0xe9   : > { %v612_v48 = vpop.f32.mrf.mxu0  ;;  %v624_v49 = vpop.f32.mrf.mxu1 }
  0xea   : > { %434 = vst.msk [vmem:[%s748_s7 + $0x10] sm:$0xf] %vm429_vm1, %v549_v46  ;;  %442 = vst.msk [vmem:[%s748_s7 + $0x30] sm:$0xf] %vm429_vm1, %v557_v47  ;;  %v552_v50 = vpack.c.bf16 %v612_v48, %v612_v48  ;;  %v560_v51 = vpack.c.bf16 %v624_v49, %v624_v49 }
  0xeb   : > { %v316_v52 = vpop.f32.mrf.mxu0  ;;  %v356_v53 = vpop.f32.mrf.mxu1 }
  0xec   : > { %437 = vst.msk [vmem:[%s748_s7 + $0x1c] sm:$0xf] %vm429_vm1, %v552_v50  ;;  %445 = vst.msk [vmem:[%s748_s7 + $0x3c] sm:$0xf] %vm429_vm1, %v560_v51  ;;  %v551_v54 = vpack.c.bf16 %v316_v52, %v316_v52  ;;  %v559_v55 = vpack.c.bf16 %v356_v53, %v356_v53 }
  0xee   : > { %436 = vst.msk [vmem:[%s748_s7 + $0x18] sm:$0xf] %vm429_vm1, %v551_v54  ;;  %444 = vst.msk [vmem:[%s748_s7 + $0x38] sm:$0xf] %vm429_vm1, %v559_v55 }
  0xef PF: > { %s12_s9 = sadd.s32 1, %s655_s9  }
  0xf0   : > { %p9_p4 = scmp.ge.s32.totalorder %s12_s9, 4  }
  0xf2   :  { %11 = sbr.rel (!%p9_p4) target bundleno = 1 (0x1), region = 58 }

</bundles_post_ra>
